<compile_context>
chip_gen: v6e
topology: v6e:2x2x1
jax: 0.10.0
libtpu: 0.0.40
codegen_flags: <defaults>
</compile_context>

<pallas_src>
import jax
import jax.numpy as jnp
from jax.experimental import pallas as pl
from jax.experimental.pallas import tpu as pltpu


def _selector_kernel(x_ref, w_ref, b_ref, out_ref):
    """Router hot path: matmul (MXU) + bias + numerically-stable softmax.

    x_ref:   (TM, H)  token tile x hidden          (native dtype)
    w_ref:   (H, E)   hidden x n_experts (resident, native dtype)
    b_ref:   (1, E)   bias (f32, resident)
    out_ref: (TM, E)  softmax routing weights over experts (f32)
    """
    # Feed the MXU natively; accumulate in f32.
    logits = (
        jnp.dot(x_ref[...], w_ref[...], preferred_element_type=jnp.float32)
        + b_ref[...].astype(jnp.float32)
    )
    # Stable softmax over the expert (last / lane) axis.  Exact divide: the
    # approx-EUP reciprocal was not accurate enough for routing-weight sums.
    m = jnp.max(logits, axis=-1, keepdims=True)
    e = jnp.exp(logits - m)
    denom = jnp.sum(e, axis=-1, keepdims=True)
    out_ref[...] = e / denom


def _pick_token_tile(tokens: int, hidden: int, itemsize: int) -> int:
    """Pick a token-block size that streams near the HBM roofline while the
    double-buffered x tile stays comfortably inside scoped VMEM on all
    generations (v5e 16 MiB / v6e 32 MiB scoped default / v7x 64 MiB phys)."""
    # ~8 MiB per x buffer (=> 16 MiB double-buffered) as the budget.
    budget_bytes = 8 * 1024 * 1024
    tm = budget_bytes // max(1, hidden * itemsize)
    tm = max(8, min(1024, tm))
    tm = (tm // 8) * 8  # sublane-aligned block rows
    if tokens <= tm:
        # Small problem: a single full-extent block satisfies the (8,128)
        # rule (block dim == full array dim).
        return tokens
    return tm


def selector_forward(x, w, b):
    """x: (batch, seq, hidden) -> routing weights (batch, seq, n_experts)."""
    batch, seq, hidden = x.shape
    n_experts = w.shape[1]
    tokens = batch * seq

    x2d = x.reshape(tokens, hidden)
    b2d = b.reshape(1, n_experts).astype(jnp.float32)

    tm = _pick_token_tile(tokens, hidden, x2d.dtype.itemsize)
    grid = (pl.cdiv(tokens, tm),)

    # Advisory cost model: memory-dominated streaming kernel.
    bytes_accessed = (
        tokens * hidden * x2d.dtype.itemsize        # x stream in
        + hidden * n_experts * w.dtype.itemsize     # resident weights
        + n_experts * 4                             # bias
        + tokens * n_experts * 4                    # softmax weights out
    )
    cost = pl.CostEstimate(
        flops=2 * tokens * hidden * n_experts,
        transcendentals=tokens * n_experts,
        bytes_accessed=bytes_accessed,
    )

    # Scoped VMEM: double-buffered x + out tiles, resident w/b, plus headroom.
    vmem_bytes = (
        2 * tm * hidden * x2d.dtype.itemsize
        + 2 * tm * n_experts * 4
        + hidden * n_experts * w.dtype.itemsize
        + n_experts * 4
        + (4 << 20)
    )
    vmem_bytes = min(max(vmem_bytes, 4 << 20), 48 << 20)

    out = pl.pallas_call(
        _selector_kernel,
        out_shape=jax.ShapeDtypeStruct((tokens, n_experts), jnp.float32),
        grid_spec=pltpu.PrefetchScalarGridSpec(
            num_scalar_prefetch=0,
            grid=grid,
            in_specs=[
                pl.BlockSpec((tm, hidden), lambda i: (i, 0)),         # streamed
                pl.BlockSpec((hidden, n_experts), lambda i: (0, 0)),  # resident
                pl.BlockSpec((1, n_experts), lambda i: (0, 0)),       # resident
            ],
            out_specs=pl.BlockSpec((tm, n_experts), lambda i: (i, 0)),
        ),
        compiler_params=pltpu.CompilerParams(
            dimension_semantics=("parallel",),
            vmem_limit_bytes=vmem_bytes,
        ),
        cost_estimate=cost,
    )(x2d, w, b2d)

    return out.reshape(batch, seq, n_experts)


if __name__ == "__main__":
    # Small, forward-consistent shapes.
    batch, seq, hidden, n_experts = 2, 8, 32, 4

    key = jax.random.PRNGKey(0)
    kx, kw, kb = jax.random.split(key, 3)

    x = jax.random.normal(kx, (batch, seq, hidden), dtype=jnp.float32)
    # Deterministic "router" parameters (shapes implied by hidden -> n_experts).
    w = jax.random.normal(kw, (hidden, n_experts), dtype=jnp.float32) * 0.02
    b = jax.random.normal(kb, (n_experts,), dtype=jnp.float32) * 0.02

    weights = selector_forward(x, w, b)
    jax.block_until_ready(weights)

    # Sanity: rows of routing weights sum to ~1.
    row_sums = jnp.sum(weights, axis=-1)
    assert jnp.allclose(row_sums, jnp.ones_like(row_sums), atol=1e-4), row_sums

    # Cross-check against plain JAX reference.
    ref = jax.nn.softmax(x.reshape(-1, hidden) @ w + b, axis=-1).reshape(
        batch, seq, n_experts
    )
    assert jnp.allclose(weights, ref, atol=1e-4, rtol=1e-4)

    print("KERNEL_OK")
</pallas_src>

<mosaic_0001>
module attributes {stable_mosaic.version = 11 : i64} {
  func.func @_selector_kernel(%arg0: i32, %arg1: memref<16x32xf32, #tpu.memory_space<vmem>>, %arg2: memref<32x4xf32, #tpu.memory_space<vmem>>, %arg3: memref<1x4xf32, #tpu.memory_space<vmem>>, %arg4: memref<16x4xf32, #tpu.memory_space<vmem>>) attributes {dimension_semantics = [#tpu.dimension_semantics<parallel>], iteration_bounds = array<i64: 1>, scalar_prefetch = 0 : i64, scratch_operands = 0 : i64, tpu.core_type = #tpu.core_type<tc>, window_params = [{transform_indices = @transform_0, window_bounds = array<i64: 16, 32>}, {pipeline_mode = #tpu.pipeline_mode<synchronous>, transform_indices = @transform_1, window_bounds = array<i64: 32, 4>}, {pipeline_mode = #tpu.pipeline_mode<synchronous>, transform_indices = @transform_2, window_bounds = array<i64: 1, 4>}, {transform_indices = @transform_3, window_bounds = array<i64: 16, 4>}]} {
    %c0 = arith.constant 0 : index
    %c0_0 = arith.constant 0 : index
    %0 = vector.load %arg1[%c0, %c0_0] : memref<16x32xf32, #tpu.memory_space<vmem>>, vector<16x32xf32>
    %c0_1 = arith.constant 0 : index
    %c0_2 = arith.constant 0 : index
    %1 = vector.load %arg2[%c0_1, %c0_2] : memref<32x4xf32, #tpu.memory_space<vmem>>, vector<32x4xf32>
    %cst = arith.constant dense<0.000000e+00> : vector<16x4xf32>
    %2 = tpu.matmul %0, %1, %cst {dimension_numbers = #tpu.dot_dimension_numbers<[1], [0], [0], [1], [0, 0, 1, 1], [], []>} : vector<16x32xf32>, vector<32x4xf32>, vector<16x4xf32> -> vector<16x4xf32>
    %c0_3 = arith.constant 0 : index
    %c0_4 = arith.constant 0 : index
    %3 = vector.load %arg3[%c0_3, %c0_4] : memref<1x4xf32, #tpu.memory_space<vmem>>, vector<1x4xf32>
    %4 = vector.broadcast %3 : vector<1x4xf32> to vector<16x4xf32>
    %5 = arith.addf %2, %4 : vector<16x4xf32>
    %cst_5 = arith.constant dense<0xFF800000> : vector<16xf32>
    %6 = vector.multi_reduction <maximumf>, %5, %cst_5 [1] : vector<16x4xf32> to vector<16xf32>
    %7 = vector.shape_cast %6 : vector<16xf32> to vector<16x1xf32>
    %8 = vector.broadcast %7 : vector<16x1xf32> to vector<16x4xf32>
    %9 = arith.subf %5, %8 : vector<16x4xf32>
    %10 = math.exp %9 : vector<16x4xf32>
    %cst_6 = arith.constant dense<0.000000e+00> : vector<16xf32>
    %11 = vector.multi_reduction <add>, %10, %cst_6 [1] : vector<16x4xf32> to vector<16xf32>
    %12 = vector.shape_cast %11 : vector<16xf32> to vector<16x1xf32>
    %13 = vector.broadcast %12 : vector<16x1xf32> to vector<16x4xf32>
    %14 = arith.divf %10, %13 : vector<16x4xf32>
    %c0_7 = arith.constant 0 : index
    %c0_8 = arith.constant 0 : index
    %15 = vector.load %arg4[%c0_7, %c0_8] : memref<16x4xf32, #tpu.memory_space<vmem>>, vector<16x4xf32>
    tpu.vector_store %arg4[%c0_7, %c0_8], %14 {strides = array<i32>} : memref<16x4xf32, #tpu.memory_space<vmem>>, vector<16x4xf32>,
    return
  }
  func.func @transform_0(%arg0: i32) -> (i32, i32) {
    %c0_i32 = arith.constant 0 : i32
    %c0_i32_0 = arith.constant 0 : i32
    return %arg0, %c0_i32 : i32, i32
  }
  func.func @transform_1(%arg0: i32) -> (i32, i32) {
    %c0_i32 = arith.constant 0 : i32
    %c0_i32_0 = arith.constant 0 : i32
    %c0_i32_1 = arith.constant 0 : i32
    return %c0_i32, %c0_i32_0 : i32, i32
  }
  func.func @transform_2(%arg0: i32) -> (i32, i32) {
    %c0_i32 = arith.constant 0 : i32
    %c0_i32_0 = arith.constant 0 : i32
    %c0_i32_1 = arith.constant 0 : i32
    return %c0_i32, %c0_i32_0 : i32, i32
  }
  func.func @transform_3(%arg0: i32) -> (i32, i32) {
    %c0_i32 = arith.constant 0 : i32
    %c0_i32_0 = arith.constant 0 : i32
    return %arg0, %c0_i32 : i32, i32
  }
}

</mosaic_0001>

<bundles_post_ra>
// kernel: tpu_custom_call.1
= control target key start
LH: loop header
LB: loop body
LE: loop exit
PB: predicated region body
PF: predicated region fallthrough
CT: control target
= control target key end

     0   :  { %vm27_vm0 = vcmask 261120   ;;  %vm109_vm1 = vcmask 31744   ;;  %s221_s1 = inlined_call_operand.vmem [shape: f32[32,4], index: 1, kind: input, shape index: {}]   ;;  %s222_s0 = inlined_call_operand.vmem [shape: f32[16,32], index: 0, kind: input, shape index: {}]   ;;  %s223_s2 = inlined_call_operand.vmem [shape: f32[1,4], index: 2, kind: input, shape index: {}]   ;;  %s224_s3 = inlined_call_operand.vmem [shape: f32[16,4], index: 3, kind: output, shape index: {}]  }
   0x1   :  { %v19_v0 = vld [vmem:[%s221_s1 + $0x18] sm:$0xff]  ;;  %v18_v1 = vld [vmem:[%s221_s1 + $0x10] sm:$0xff]  ;;  %v14_v2 = vld [vmem:[%s222_s0] sm:$0xff] }
   0x2   :  { %147 = vmatprep.subr.mxu0 %v19_v0  ;;  %v17_v3 = vld [vmem:[%s221_s1 + $0x8] sm:$0xff]  ;;  %155 = vmatprep.mubr.msk.f32.mxu0 %vm27_vm0, %v14_v2  ;;  %v16_v4 = vld [vmem:[%s221_s1] sm:$0xff] }
   0x3   :  { %148 = vmatpush3.msra.mxu0 %v19_v0  ;;  %v15_v5 = vld [vmem:[%s222_s0 + $0x8] sm:$0xff]  ;;  %v138_v7 = vld [vmem:[%s223_s2] ss:$0 sm:$0xff] }
   0x4   :  { %149 = vmatprep.subr.mxu0 %v18_v1 }
   0x5   :  { %150 = vmatpush3.msra.mxu0 %v18_v1 }
   0x6   :  { %151 = vmatprep.subr.mxu0 %v17_v3 }
   0x7   :  { %152 = vmatpush3.msra.mxu0 %v17_v3 }
   0x8   :  { %153 = vmatprep.subr.mxu0 %v16_v4 }
   0x9   :  { %154 = vmatpush3.msra.mxu0 %v16_v4 }
   0xa   :  { %156 = vmatmul.mubr.msk.f32.vlgmr.msra.gmra.mxu0 %vm27_vm0, %v15_v5 }
  0xca   :  { %v157_v6 = vpop.f32.mrf.mxu0 }
  0xcb   :  { %v106_v10 = vadd.f32 %v157_v6, %v138_v7 }
  0xcc   :  { %v100_v8 = vpop.f32.mrf.mxu0 }
  0xcd   :  { %v101_v9 = vadd.f32 %v138_v7, %v100_v8  ;;  %v113_v12 = vsel %vm109_vm1, %v106_v10, -inf }
  0xcf   :  { %v110_v11 = vsel %vm109_vm1, %v101_v9, -inf }
  0xd0   :  { %111 = vmax.xlane.f32.xlu0 %v110_v11 }
  0xd4   :  { %114 = vmax.xlane.f32.xlu0 %v113_v12 }
 0x159   :  { %v112_v13 = vpop.xlane.xlu0 %111 }
 0x15a   :  { %v116_v14 = vsub.f32 %v101_v9, %v112_v13 }
 0x15c   :  { %v118_v15 = vmul.f32 1.442695, %v116_v14 }
 0x15d   :  { %v115_v16 = vpop.xlane.xlu0 %114 }
 0x15e   :  { %158 = vpow2.f32 %v118_v15  ;;  %v117_v17 = vsub.f32 %v106_v10, %v115_v16 }
 0x160   :  { %v120_v18 = vmul.f32 1.442695, %v117_v17 }
 0x162   :  { %160 = vpow2.f32 %v120_v18 }
 0x16b   :  { %v159_v19 = vpop.eup %158 }
 0x16c   :  { %v122_v20 = vsel %vm109_vm1, %v159_v19, 0.0 }
 0x16d   :  { %123 = vadd.xlane.f32.xlu1 %v122_v20 }
 0x16f   :  { %v161_v21 = vpop.eup %160 }
 0x170   :  { %v125_v22 = vsel %vm109_vm1, %v161_v21, 0.0 }
 0x171   :  { %126 = vadd.xlane.f32.xlu1 %v125_v22 }
 0x1f6   :  { %v124_v23 = vpop.xlane.xlu1 %123 }
 0x1f7   :  { %162 = vrcp.f32 %v124_v23 }
 0x1fa   :  { %v127_v24 = vpop.xlane.xlu1 %126 }
 0x1fb   :  { %164 = vrcp.f32 %v127_v24 }
 0x204   :  { %v163_v25 = vpop.eup %162 }
 0x205   :  { %v129_v26 = vmul.f32 %v163_v25, %v159_v19 }
 0x207   :  { %132 = vst.msk [vmem:[%s224_s3] sm:$0xff] %vm109_vm1, %v129_v26 }
 0x208   :  { %v165_v27 = vpop.eup %164 }
 0x209   :  { %v131_v28 = vmul.f32 %v165_v27, %v161_v21 }
 0x20b   :  { %133 = vst.msk [vmem:[%s224_s3 + $0x8] sm:$0xff] %vm109_vm1, %v131_v28 }

</bundles_post_ra>
